<compile_context>
chip_gen: v7x
topology: tpu7x:2x2x1
jax: 0.10.0
libtpu: 0.0.40
codegen_flags: <defaults>
</compile_context>

<pallas_src>
import numpy as np
import jax
import jax.numpy as jnp
from jax.experimental import pallas as pl
from jax.experimental.pallas import tpu as pltpu

# ----------------------------- config ---------------------------------------
B = 2            # batch
S = 8            # sequence length
DIM = 32         # model dim
NUM_HEADS = 4
HEAD_DIM = DIM // NUM_HEADS
LATENT = 16      # latent_dim
ROPE_THETA = 10000.0
SCALE = HEAD_DIM ** -0.5
NUM_PROJ = 5                     # q, q@R, k, k@R, v
G = NUM_PROJ * NUM_HEADS         # stacked head-major projection count


# ----------------------------- kernel ---------------------------------------
def mla_kernel(x_ref, w_ref, wo_ref, rope_ref, o_ref):
    x = x_ref[...]                                   # (S, DIM)   one batch
    cos = rope_ref[0]                                # (S, HD)
    sin = rope_ref[1]                                # (S, HD)

    # All 5 projections, all heads, one batched MXU dot:
    # (G, S, DIM) x (G, DIM, HD) -> (G, S, HD).  No lane slicing.
    xb = jnp.broadcast_to(x, (G, S, DIM))
    proj = jnp.einsum('gsd,gdh->gsh', xb, w_ref[...],
                      preferred_element_type=jnp.float32)
    proj = proj.reshape(NUM_PROJ, NUM_HEADS, S, HEAD_DIM)   # leading dims only
    q, qr, k, kr, v = proj[0], proj[1], proj[2], proj[3], proj[4]

    # RoPE (rotate_half folded into the *R weights; scale folded into q).
    q = q * cos + qr * sin                           # (H, S, HD)
    k = k * cos + kr * sin                           # (H, S, HD)

    # Per-head attention, batched over heads.  No mask needed: this grid step
    # only sees its own batch's tokens.
    s = jnp.einsum('hqd,hkd->hqk', q, k, preferred_element_type=jnp.float32)
    m = jnp.max(s, axis=-1, keepdims=True)
    e = jnp.exp(s - m)
    p = e / jnp.sum(e, axis=-1, keepdims=True)
    attn = jnp.einsum('hqk,hkd->hqd', p, v, preferred_element_type=jnp.float32)

    # Output projection per head, reduce over heads (leading-axis sum = plain
    # VPU adds, no relayout), single store of the whole (S, DIM) block.
    out = jnp.einsum('hqd,hdm->hqm', attn, wo_ref[...],
                     preferred_element_type=jnp.float32).sum(axis=0)
    o_ref[...] = out.astype(o_ref.dtype)


# ----------------------------- wrapper ---------------------------------------
def mla_forward(x, w_all, wo_h, rope):
    return pl.pallas_call(
        mla_kernel,
        out_shape=jax.ShapeDtypeStruct((B, S, DIM), jnp.float32),
        grid=(B,),
        in_specs=[
            pl.BlockSpec((None, S, DIM), lambda b: (b, 0, 0)),        # x (per batch)
            pl.BlockSpec((G, DIM, HEAD_DIM), lambda b: (0, 0, 0)),    # fused proj weights
            pl.BlockSpec((NUM_HEADS, HEAD_DIM, DIM), lambda b: (0, 0, 0)),  # out proj
            pl.BlockSpec((2, S, HEAD_DIM), lambda b: (0, 0, 0)),      # [cos; sin]
        ],
        out_specs=pl.BlockSpec((None, S, DIM), lambda b: (b, 0, 0)),
        compiler_params=pltpu.CompilerParams(
            dimension_semantics=("parallel",)),
    )(x, w_all, wo_h, rope)


# --------------------- reference (plain JAX, matches torch module) ------------
def rotate_half_ref(x):
    x1 = x[..., ::2]
    x2 = x[..., 1::2]
    return jnp.stack((-x2, x1), axis=-1).reshape(x.shape)


def mla_reference(x, params, cos_hd, sin_hd):
    wq_t, wdkv_t, wuk_t, wuv_t, wo_t = params
    b, s, _ = x.shape
    q = (x @ wq_t).reshape(b, s, NUM_HEADS, HEAD_DIM).transpose(0, 2, 1, 3)
    dkv = (x @ wdkv_t).reshape(b, s, 2, LATENT)
    d_k, d_v = dkv[:, :, 0], dkv[:, :, 1]
    k = (d_k @ wuk_t).reshape(b, s, NUM_HEADS, HEAD_DIM).transpose(0, 2, 1, 3)
    v = (d_v @ wuv_t).reshape(b, s, NUM_HEADS, HEAD_DIM).transpose(0, 2, 1, 3)
    q = q * cos_hd + rotate_half_ref(q) * sin_hd
    k = k * cos_hd + rotate_half_ref(k) * sin_hd
    scores = jnp.einsum('bhqd,bhkd->bhqk', q, k) * SCALE
    p = jax.nn.softmax(scores, axis=-1)
    out = jnp.einsum('bhqk,bhkd->bhqd', p, v)
    out = out.transpose(0, 2, 1, 3).reshape(b, s, DIM)
    return out @ wo_t


# ----------------------------- main -------------------------------------------
if __name__ == "__main__":
    key = jax.random.PRNGKey(0)
    k_x, k_q, k_dkv, k_uk, k_uv, k_o = jax.random.split(key, 6)

    x = jax.random.normal(k_x, (B, S, DIM), dtype=jnp.float32)

    # nn.Linear weight shape is (out, in); pass transposed so y = x @ W^T.
    def init_w(k, out_f, in_f):
        return (0.02 * jax.random.normal(k, (out_f, in_f), dtype=jnp.float32)).T

    wq_t = init_w(k_q, DIM, DIM)                 # (DIM, DIM)
    wdkv_t = init_w(k_dkv, 2 * LATENT, DIM)      # (DIM, 2*LATENT)
    wuk_t = init_w(k_uk, DIM, LATENT)            # (LATENT, DIM)
    wuv_t = init_w(k_uv, DIM, LATENT)            # (LATENT, DIM)
    wo_t = init_w(k_o, DIM, DIM)                 # (DIM, DIM)

    # RoPE cache, exactly as the torch module builds it: emb = cat(freqs, freqs)
    inv_freq = 1.0 / ROPE_THETA ** (np.arange(0, HEAD_DIM, 2, dtype=np.float32) / HEAD_DIM)
    t = np.arange(S, dtype=np.float32)
    freqs = np.einsum('i,j->ij', t, inv_freq)                      # (S, HD/2)
    emb = np.concatenate((freqs, freqs), axis=-1)                  # (S, HD)
    rope = jnp.asarray(np.stack([np.cos(emb), np.sin(emb)], axis=0),
                       dtype=jnp.float32)                          # (2, S, HD)
    cos_hd, sin_hd = rope[0], rope[1]

    # rotate_half as a per-head block-diagonal right-multiply matrix (folded
    # into the weights host-side — RoPE is linear, so this is exact).
    R_hd = np.zeros((HEAD_DIM, HEAD_DIM), dtype=np.float32)
    for i in range(HEAD_DIM // 2):
        R_hd[2 * i + 1, 2 * i] = -1.0   # out[2i]   = -x[2i+1]
        R_hd[2 * i, 2 * i + 1] = 1.0    # out[2i+1] =  x[2i]
    rot = jnp.asarray(np.kron(np.eye(NUM_HEADS, dtype=np.float32), R_hd))  # (DIM, DIM)

    wq_s = wq_t * SCALE                               # fold 1/sqrt(head_dim)
    # TODO(synk): folding the low-rank dkv -> k/v path into dense (DIM, DIM)
    # weights is exact but forfeits the latent-dim compute saving; keep it
    # factored for non-toy sizes.
    wk_full = wdkv_t[:, :LATENT] @ wuk_t              # (DIM, DIM)
    wv_full = wdkv_t[:, LATENT:] @ wuv_t              # (DIM, DIM)

    def to_heads(w):  # (DIM, DIM) column-head-major -> (H, DIM, HD)
        return jnp.transpose(w.reshape(DIM, NUM_HEADS, HEAD_DIM), (1, 0, 2))

    # Stacked head-major projection slab: [q | q@R | k | k@R | v]  -> (5H, DIM, HD)
    w_all = jnp.concatenate([to_heads(wq_s), to_heads(wq_s @ rot),
                             to_heads(wk_full), to_heads(wk_full @ rot),
                             to_heads(wv_full)], axis=0)
    wo_h = wo_t.reshape(NUM_HEADS, HEAD_DIM, DIM)     # (H, HD, DIM)

    out = jax.block_until_ready(mla_forward(x, w_all, wo_h, rope))

    ref = mla_reference(x, (wq_t, wdkv_t, wuk_t, wuv_t, wo_t), cos_hd, sin_hd)
    np.testing.assert_allclose(np.asarray(out), np.asarray(ref), rtol=2e-3, atol=1e-5)

    print("KERNEL_OK")
</pallas_src>

<mosaic_0001>
module attributes {stable_mosaic.version = 11 : i64} {
  func.func @mla_kernel(%arg0: i32, %arg1: memref<1x8x32xf32, #tpu.memory_space<vmem>>, %arg2: memref<20x32x8xf32, #tpu.memory_space<vmem>>, %arg3: memref<4x8x32xf32, #tpu.memory_space<vmem>>, %arg4: memref<2x8x8xf32, #tpu.memory_space<vmem>>, %arg5: memref<1x8x32xf32, #tpu.memory_space<vmem>>) attributes {dimension_semantics = [#tpu.dimension_semantics<parallel>], iteration_bounds = array<i64: 2>, scalar_prefetch = 0 : i64, scratch_operands = 0 : i64, tpu.core_type = #tpu.core_type<tc>, window_params = [{transform_indices = @transform_0, window_bounds = array<i64: 1, 8, 32>}, {pipeline_mode = #tpu.pipeline_mode<synchronous>, transform_indices = @transform_1, window_bounds = array<i64: 20, 32, 8>}, {pipeline_mode = #tpu.pipeline_mode<synchronous>, transform_indices = @transform_2, window_bounds = array<i64: 4, 8, 32>}, {pipeline_mode = #tpu.pipeline_mode<synchronous>, transform_indices = @transform_3, window_bounds = array<i64: 2, 8, 8>}, {transform_indices = @transform_4, window_bounds = array<i64: 1, 8, 32>}]} {
    %c0 = arith.constant 0 : index
    %c0_0 = arith.constant 0 : index
    %c0_1 = arith.constant 0 : index
    %0 = vector.load %arg1[%c0, %c0_0, %c0_1] : memref<1x8x32xf32, #tpu.memory_space<vmem>>, vector<1x8x32xf32>
    %1 = vector.shape_cast %0 : vector<1x8x32xf32> to vector<8x32xf32>
    %c0_2 = arith.constant 0 : index
    %c0_3 = arith.constant 0 : index
    %c0_4 = arith.constant 0 : index
    %2 = vector.load %arg4[%c0_2, %c0_3, %c0_4] : memref<2x8x8xf32, #tpu.memory_space<vmem>>, vector<1x8x8xf32>
    %3 = vector.shape_cast %2 : vector<1x8x8xf32> to vector<8x8xf32>
    %c1 = arith.constant 1 : index
    %c0_5 = arith.constant 0 : index
    %c0_6 = arith.constant 0 : index
    %4 = vector.load %arg4[%c1, %c0_5, %c0_6] : memref<2x8x8xf32, #tpu.memory_space<vmem>>, vector<1x8x8xf32>
    %5 = vector.shape_cast %4 : vector<1x8x8xf32> to vector<8x8xf32>
    %6 = vector.shape_cast %1 : vector<8x32xf32> to vector<1x8x32xf32>
    %7 = vector.broadcast %6 : vector<1x8x32xf32> to vector<20x8x32xf32>
    %c0_7 = arith.constant 0 : index
    %c0_8 = arith.constant 0 : index
    %c0_9 = arith.constant 0 : index
    %8 = vector.load %arg2[%c0_7, %c0_8, %c0_9] : memref<20x32x8xf32, #tpu.memory_space<vmem>>, vector<20x32x8xf32>
    "tpu.trace_start"() <{level = 10 : i32, message = "gsd,gdh->gsh"}> : () -> ()
    %cst = arith.constant dense<0.000000e+00> : vector<20x8x8xf32>
    %9 = tpu.matmul %7, %8, %cst {dimension_numbers = #tpu.dot_dimension_numbers<[2], [1], [1], [2], [0, 0, 0, 1, 1, 2], [0], [0]>} : vector<20x8x32xf32>, vector<20x32x8xf32>, vector<20x8x8xf32> -> vector<20x8x8xf32>
    "tpu.trace_stop"() : () -> ()
    %10 = vector.shape_cast %9 : vector<20x8x8xf32> to vector<5x4x8x8xf32>
    %11 = vector.extract_strided_slice %10 {offsets = [0, 0, 0, 0], sizes = [1, 4, 8, 8], strides = [1, 1, 1, 1]} : vector<5x4x8x8xf32> to vector<1x4x8x8xf32>
    %12 = vector.shape_cast %11 : vector<1x4x8x8xf32> to vector<4x8x8xf32>
    %13 = vector.extract_strided_slice %10 {offsets = [1, 0, 0, 0], sizes = [1, 4, 8, 8], strides = [1, 1, 1, 1]} : vector<5x4x8x8xf32> to vector<1x4x8x8xf32>
    %14 = vector.shape_cast %13 : vector<1x4x8x8xf32> to vector<4x8x8xf32>
    %15 = vector.extract_strided_slice %10 {offsets = [2, 0, 0, 0], sizes = [1, 4, 8, 8], strides = [1, 1, 1, 1]} : vector<5x4x8x8xf32> to vector<1x4x8x8xf32>
    %16 = vector.shape_cast %15 : vector<1x4x8x8xf32> to vector<4x8x8xf32>
    %17 = vector.extract_strided_slice %10 {offsets = [3, 0, 0, 0], sizes = [1, 4, 8, 8], strides = [1, 1, 1, 1]} : vector<5x4x8x8xf32> to vector<1x4x8x8xf32>
    %18 = vector.shape_cast %17 : vector<1x4x8x8xf32> to vector<4x8x8xf32>
    %19 = vector.extract_strided_slice %10 {offsets = [4, 0, 0, 0], sizes = [1, 4, 8, 8], strides = [1, 1, 1, 1]} : vector<5x4x8x8xf32> to vector<1x4x8x8xf32>
    %20 = vector.shape_cast %19 : vector<1x4x8x8xf32> to vector<4x8x8xf32>
    %21 = vector.shape_cast %3 : vector<8x8xf32> to vector<1x8x8xf32>
    %22 = vector.broadcast %21 : vector<1x8x8xf32> to vector<4x8x8xf32>
    %23 = arith.mulf %12, %22 : vector<4x8x8xf32>
    %24 = vector.shape_cast %5 : vector<8x8xf32> to vector<1x8x8xf32>
    %25 = vector.broadcast %24 : vector<1x8x8xf32> to vector<4x8x8xf32>
    %26 = arith.mulf %14, %25 : vector<4x8x8xf32>
    %27 = arith.addf %23, %26 : vector<4x8x8xf32>
    %28 = vector.shape_cast %3 : vector<8x8xf32> to vector<1x8x8xf32>
    %29 = vector.broadcast %28 : vector<1x8x8xf32> to vector<4x8x8xf32>
    %30 = arith.mulf %16, %29 : vector<4x8x8xf32>
    %31 = vector.shape_cast %5 : vector<8x8xf32> to vector<1x8x8xf32>
    %32 = vector.broadcast %31 : vector<1x8x8xf32> to vector<4x8x8xf32>
    %33 = arith.mulf %18, %32 : vector<4x8x8xf32>
    %34 = arith.addf %30, %33 : vector<4x8x8xf32>
    "tpu.trace_start"() <{level = 10 : i32, message = "hqd,hkd->hqk"}> : () -> ()
    %cst_10 = arith.constant dense<0.000000e+00> : vector<4x8x8xf32>
    %35 = tpu.matmul %27, %34, %cst_10 {dimension_numbers = #tpu.dot_dimension_numbers<[2], [2], [1], [1], [0, 0, 0, 1, 1, 1], [0], [0]>} : vector<4x8x8xf32>, vector<4x8x8xf32>, vector<4x8x8xf32> -> vector<4x8x8xf32>
    "tpu.trace_stop"() : () -> ()
    %cst_11 = arith.constant dense<0xFF800000> : vector<4x8xf32>
    %36 = vector.multi_reduction <maximumf>, %35, %cst_11 [2] : vector<4x8x8xf32> to vector<4x8xf32>
    %37 = vector.shape_cast %36 : vector<4x8xf32> to vector<4x8x1xf32>
    %38 = vector.broadcast %37 : vector<4x8x1xf32> to vector<4x8x8xf32>
    %39 = arith.subf %35, %38 : vector<4x8x8xf32>
    %40 = math.exp %39 : vector<4x8x8xf32>
    %cst_12 = arith.constant dense<0.000000e+00> : vector<4x8xf32>
    %41 = vector.multi_reduction <add>, %40, %cst_12 [2] : vector<4x8x8xf32> to vector<4x8xf32>
    %42 = vector.shape_cast %41 : vector<4x8xf32> to vector<4x8x1xf32>
    %43 = vector.broadcast %42 : vector<4x8x1xf32> to vector<4x8x8xf32>
    %44 = arith.divf %40, %43 : vector<4x8x8xf32>
    "tpu.trace_start"() <{level = 10 : i32, message = "hqk,hkd->hqd"}> : () -> ()
    %cst_13 = arith.constant dense<0.000000e+00> : vector<4x8x8xf32>
    %45 = tpu.matmul %44, %20, %cst_13 {dimension_numbers = #tpu.dot_dimension_numbers<[2], [1], [1], [2], [0, 0, 0, 1, 1, 2], [0], [0]>} : vector<4x8x8xf32>, vector<4x8x8xf32>, vector<4x8x8xf32> -> vector<4x8x8xf32>
    "tpu.trace_stop"() : () -> ()
    %c0_14 = arith.constant 0 : index
    %c0_15 = arith.constant 0 : index
    %c0_16 = arith.constant 0 : index
    %46 = vector.load %arg3[%c0_14, %c0_15, %c0_16] : memref<4x8x32xf32, #tpu.memory_space<vmem>>, vector<4x8x32xf32>
    "tpu.trace_start"() <{level = 10 : i32, message = "hqd,hdm->hqm"}> : () -> ()
    %cst_17 = arith.constant dense<0.000000e+00> : vector<4x8x32xf32>
    %47 = tpu.matmul %45, %46, %cst_17 {dimension_numbers = #tpu.dot_dimension_numbers<[2], [1], [1], [2], [0, 0, 0, 1, 1, 2], [0], [0]>} : vector<4x8x8xf32>, vector<4x8x32xf32>, vector<4x8x32xf32> -> vector<4x8x32xf32>
    "tpu.trace_stop"() : () -> ()
    %cst_18 = arith.constant dense<0.000000e+00> : vector<8x32xf32>
    %48 = vector.multi_reduction <add>, %47, %cst_18 [0] : vector<4x8x32xf32> to vector<8x32xf32>
    %c0_19 = arith.constant 0 : index
    %c0_20 = arith.constant 0 : index
    %c0_21 = arith.constant 0 : index
    %49 = vector.load %arg5[%c0_19, %c0_20, %c0_21] : memref<1x8x32xf32, #tpu.memory_space<vmem>>, vector<1x8x32xf32>
    %50 = vector.shape_cast %49 : vector<1x8x32xf32> to vector<8x32xf32>
    %51 = vector.shape_cast %48 : vector<8x32xf32> to vector<1x8x32xf32>
    tpu.vector_store %arg5[%c0_19, %c0_20, %c0_21], %51 {strides = array<i32>} : memref<1x8x32xf32, #tpu.memory_space<vmem>>, vector<1x8x32xf32>,
    return
  }
  func.func @transform_0(%arg0: i32) -> (i32, i32, i32) {
    %c0_i32 = arith.constant 0 : i32
    %c0_i32_0 = arith.constant 0 : i32
    %c0_i32_1 = arith.constant 0 : i32
    return %arg0, %c0_i32, %c0_i32_0 : i32, i32, i32
  }
  func.func @transform_1(%arg0: i32) -> (i32, i32, i32) {
    %c0_i32 = arith.constant 0 : i32
    %c0_i32_0 = arith.constant 0 : i32
    %c0_i32_1 = arith.constant 0 : i32
    %c0_i32_2 = arith.constant 0 : i32
    return %c0_i32, %c0_i32_0, %c0_i32_1 : i32, i32, i32
  }
  func.func @transform_2(%arg0: i32) -> (i32, i32, i32) {
    %c0_i32 = arith.constant 0 : i32
    %c0_i32_0 = arith.constant 0 : i32
    %c0_i32_1 = arith.constant 0 : i32
    %c0_i32_2 = arith.constant 0 : i32
    return %c0_i32, %c0_i32_0, %c0_i32_1 : i32, i32, i32
  }
  func.func @transform_3(%arg0: i32) -> (i32, i32, i32) {
    %c0_i32 = arith.constant 0 : i32
    %c0_i32_0 = arith.constant 0 : i32
    %c0_i32_1 = arith.constant 0 : i32
    %c0_i32_2 = arith.constant 0 : i32
    return %c0_i32, %c0_i32_0, %c0_i32_1 : i32, i32, i32
  }
  func.func @transform_4(%arg0: i32) -> (i32, i32, i32) {
    %c0_i32 = arith.constant 0 : i32
    %c0_i32_0 = arith.constant 0 : i32
    %c0_i32_1 = arith.constant 0 : i32
    return %arg0, %c0_i32, %c0_i32_0 : i32, i32, i32
  }
}

</mosaic_0001>

<bundles_post_ra>
// kernel: tpu_custom_call.1
= control target key start
LH: loop header
LB: loop body
LE: loop exit
PB: predicated region body
PF: predicated region fallthrough
CT: control target
= control target key end

     0   :  { %9 = vsyncpa [#allocation3], 0  ;;  %s3993_s0 = inlined_call_operand.vmem [shape: f32[2,8,32], index: 0, kind: input, shape index: {}]   ;;  %s3994_s1 = inlined_call_operand.vmem [shape: f32[20,32,8], index: 1, kind: input, shape index: {}]   ;;  %s3995_s2 = inlined_call_operand.vmem [shape: f32[4,8,32], index: 2, kind: input, shape index: {}]   ;;  %s3996_s3 = inlined_call_operand.vmem [shape: f32[2,8,8], index: 3, kind: input, shape index: {}]   ;;  %s3997_s4 = inlined_call_operand.hbm [shape: f32[2,8,32], index: 4, kind: output, shape index: {}]  }
   0x1   :  { %11 = vsyncpa [#allocation3 + $0x1], 0  ;;  %s3445_s15 = smov 0   ;;  %s3447_s16 = smov 0  }
   0x2   :  { %s3449_s17 = smov 0   ;;  %s3451_s18 = smov 0  }
   0x3 LB: > { %s3466_s19 = sadd.s32 4294967295, %s3414_s18   ;;  %s2723_s20 = sadd.s32 4294967294, %s3414_s18   ;;  %s3414_s18 = sphi %s3451_s18, %s4003_s18   ;;  %s3410_s17 = sphi %s3449_s17, %s4002_s17   ;;  %s3406_s16 = sphi %s3447_s16, %s4001_s16   ;;  %s3402_s15 = sphi %s3445_s15, %s4000_s15  }
   0x4   : > { %s3470_s21 = sadd.s32 1, %s3414_s18   ;;  %s113_s22 = sadd.s32 1, %s3410_s17 }
   0x5   : > { %s110_s23 = ssub.s32 %s3414_s18, %s3470_s21  ;;  %p123_p0 = scmp.ne.s32.totalorder %s3410_s17, %s3406_s16 }
   0x6   : > { %p111_p1 = scmp.eq.s32.totalorder %s110_s23, 0  ;;  %p124_p2 = scmp.eq.s32.totalorder %s3466_s19, 1 }
   0x7   : > { %p129_p3 = scmp.ne.s32.totalorder %s3406_s16, %s3402_s15  ;;  %p130_p4 = scmp.eq.s32.totalorder %s2723_s20, 1 }
   0x8   : > { %s3481_s24 = scalar_select %p111_p1, %s3410_s17, %s113_s22  }
   0x9   : > { %p3483_p5 = por %p124_p2, %p123_p0  ;;  %p3487_p6 = por %p130_p4, %p129_p3 }
   0xa   : > { %p2726_p7 = scmp.ge.s32.totalorder %s3414_s18, 1  ;;  %p164_p8 = scmp.lt.s32.totalorder %s3414_s18, 3 }
   0xc   : > { %p165_p9 = pnand %p2726_p7, %p164_p8 }
   0xd   : > { %v197_v0 = vld [vmem:[%s3994_s1] sm:$0xff] (!%p165_p9)  ;;  %v198_v1 = vld [vmem:[%s3994_s1 + $0x8] sm:$0xff] (!%p165_p9)  ;;  %v3416_v3 = vmov (!%p165_p9), 0.0|0.0   ;;  %v199_v6 = vld [vmem:[%s3994_s1 + $0x10] sm:$0xff] (!%p165_p9)  ;;  %p189_p10 = scmp.lt.s32.totalorder (!%p165_p9), %s3466_s19, 1  ;;  %vm3417_vm0 = vmmov (!%p165_p9), 0  }
   0xe   : > { %168 = sbr.rel (%p165_p9) target bundleno = 1272 (0x4f8), region = 36  ;;  %v201_v2 = vld [vmem:[%s3994_s1 + $0x20] sm:$0xff] (!%p165_p9)  ;;  %3174 = vmatprep.subr.bf16.mxu0 (!%p165_p9), %v3416_v3  ;;  %3180 = vmatprep.subr.bf16.mxu1 (!%p165_p9), %v3416_v3  ;;  %v3175_v4 = vpack.c.bf16 (!%p165_p9), %v198_v1, %v197_v0  ;;  %v202_v5 = vld [vmem:[%s3994_s1 + $0x28] sm:$0xff] (!%p165_p9)  ;;  %v200_v7 = vld [vmem:[%s3994_s1 + $0x18] sm:$0xff] (!%p165_p9)  ;;  %v3418_v11 = vmov (!%p165_p9), 0.0   ;;  %vm277_vm1 = vcmask (!%p165_p9), 261120  }
   0xf   : > { %v3181_v8 = vpack.c.bf16 (!%p165_p9), %v202_v5, %v201_v2  ;;  %v203_v9 = vld [vmem:[%s3994_s1 + $0x30] sm:$0xff] (!%p165_p9)  ;;  %v204_v10 = vld [vmem:[%s3994_s1 + $0x38] sm:$0xff] (!%p165_p9)  ;;  %2902 = vmatprep.mubr.msk.f32.mxu0 (!%p165_p9), %vm3417_vm0, %v3418_v11  ;;  %2913 = vmatprep.mubr.msk.f32.mxu1 (!%p165_p9), %vm3417_vm0, %v3418_v11  ;;  %v3178_v12 = vpack.c.bf16 (!%p165_p9), %v200_v7, %v199_v6  ;;  %v205_v14 = vld [vmem:[%s3994_s1 + $0x40] sm:$0xff] (!%p165_p9)  ;;  %vm1705_vm2 = vcmask (!%p165_p9), 64512   ;;  %s186_s8 = sand.u32 (!%p165_p9), 1, %s3406_s16   ;;  %s2767_s10 = sshll.u32 (!%p165_p9), %s3466_s19, 7 }
  0x10   : > { %3176 = vmatpush3.bf16.msra.mxu0 (!%p165_p9), %v3175_v4  ;;  %v3184_v13 = vpack.c.bf16 (!%p165_p9), %v204_v10, %v203_v9  ;;  %v206_v15 = vld [vmem:[%s3994_s1 + $0x48] sm:$0xff] (!%p165_p9)  ;;  %v209_v16 = vld [vmem:[%s3994_s1 + $0x60] sm:$0xff] (!%p165_p9)  ;;  %v207_v21 = vld [vmem:[%s3994_s1 + $0x50] sm:$0xff] (!%p165_p9)  ;;  %s2727_s9 = sshll.u32 (!%p165_p9), %s186_s8, 3  ;;  %s3950_s20 = scalar_lea.hbm (!%p165_p9), %s3997_s4, %s2767_s10 }
  0x11   : > { %3182 = vmatpush3.bf16.msra.mxu1 (!%p165_p9), %v3181_v8  ;;  %3177 = vmatprep.subr.bf16.mxu0 (!%p165_p9), %v3416_v3  ;;  %v210_v17 = vld [vmem:[%s3994_s1 + $0x68] sm:$0xff] (!%p165_p9)  ;;  %v3187_v19 = vpack.c.bf16 (!%p165_p9), %v206_v15, %v205_v14  ;;  %v208_v22 = vld [vmem:[%s3994_s1 + $0x58] sm:$0xff] (!%p165_p9)  ;;  %v211_v23 = vld [vmem:[%s3994_s1 + $0x70] sm:$0xff] (!%p165_p9)  ;;  %s188_s11 = scalar_lea.vmem (!%p165_p9), [#allocation2], %s2727_s9 }
  0x12   : > { %3183 = vmatprep.subr.bf16.mxu1 (!%p165_p9), %v3416_v3  ;;  %v3193_v20 = vpack.c.bf16 (!%p165_p9), %v210_v17, %v209_v16  ;;  %v212_v24 = vld [vmem:[%s3994_s1 + $0x78] sm:$0xff] (!%p165_p9)  ;;  %v3190_v25 = vpack.c.bf16 (!%p165_p9), %v208_v22, %v207_v21  ;;  %v213_v27 = vld [vmem:[%s3994_s1 + $0x80] sm:$0xff] (!%p165_p9)  ;;  %v214_v28 = vld [vmem:[%s3994_s1 + $0x88] sm:$0xff] (!%p165_p9) }
  0x13   : > { %v3196_v26 = vpack.c.bf16 (!%p165_p9), %v212_v24, %v211_v23  ;;  %v217_v29 = vld [vmem:[%s3994_s1 + $0xa0] sm:$0xff] (!%p165_p9)  ;;  %v218_v30 = vld [vmem:[%s3994_s1 + $0xa8] sm:$0xff] (!%p165_p9)  ;;  %v3199_v31 = vpack.c.bf16 (!%p165_p9), %v214_v28, %v213_v27  ;;  %v215_v33 = vld [vmem:[%s3994_s1 + $0x90] sm:$0xff] (!%p165_p9) }
  0x14   : > { %3179 = vmatpush3.bf16.msra.mxu0 (!%p165_p9), %v3178_v12  ;;  %v3205_v32 = vpack.c.bf16 (!%p165_p9), %v218_v30, %v217_v29  ;;  %v216_v34 = vld [vmem:[%s3994_s1 + $0x98] sm:$0xff] (!%p165_p9)  ;;  %v219_v35 = vld [vmem:[%s3994_s1 + $0xb0] sm:$0xff] (!%p165_p9)  ;;  %v221_v39 = vld [vmem:[%s3994_s1 + $0xc0] sm:$0xff] (!%p165_p9) }
  0x15   : > { %s190_s23 = scalar_select %p189_p10, %s3466_s19, 1  ;;  %3185 = vmatpush3.bf16.msra.mxu1 %v3184_v13  ;;  %3186 = vmatprep.subr.bf16.mxu0 %v3416_v3  ;;  %v220_v36 = vld [vmem:[%s3994_s1 + $0xb8] sm:$0xff]  ;;  %v3202_v37 = vpack.c.bf16 %v216_v34, %v215_v33  ;;  %v222_v40 = vld [vmem:[%s3994_s1 + $0xc8] sm:$0xff]  ;;  %v225_v41 = vld [vmem:[%s3994_s1 + $0xe0] sm:$0xff] }
  0x16   : > { %3192 = vmatprep.subr.bf16.mxu1 %v3416_v3  ;;  %v3208_v38 = vpack.c.bf16 %v220_v36, %v219_v35  ;;  %v226_v42 = vld [vmem:[%s3994_s1 + $0xe8] sm:$0xff]  ;;  %v3211_v43 = vpack.c.bf16 %v222_v40, %v221_v39  ;;  %v223_v45 = vld [vmem:[%s3994_s1 + $0xd0] sm:$0xff]  ;;  %v224_v46 = vld [vmem:[%s3994_s1 + $0xd8] sm:$0xff]  ;;  %s2651_s19 = scalar_lea.sflag [#allocation3], %s186_s8 }
  0x17   : > { %s2728_s5 = sshll.u32 %s190_s23, 3  ;;  %v3217_v44 = vpack.c.bf16 %v226_v42, %v225_v41  ;;  %v227_v47 = vld [vmem:[%s3994_s1 + $0xf0] sm:$0xff]  ;;  %v228_v48 = vld [vmem:[%s3994_s1 + $0xf8] sm:$0xff]  ;;  %v3214_v49 = vpack.c.bf16 %v224_v46, %v223_v45  ;;  %v229_v51 = vld [vmem:[%s3994_s1 + $0x100] sm:$0xff]  ;;  %s3419_s23 = smov [#allocation2]  }
  0x18   : > { %s192_s12 = scalar_lea.vmem %s3993_s0, %s2728_s5  ;;  %v3220_v50 = vpack.c.bf16 %v228_v48, %v227_v47  ;;  %v230_v52 = vld [vmem:[%s3994_s1 + $0x108] sm:$0xff]  ;;  %v233_v53 = vld [vmem:[%s3994_s1 + $0x120] sm:$0xff]  ;;  %v231_v57 = vld [vmem:[%s3994_s1 + $0x110] sm:$0xff]  ;;  %s3356_s27 = sshll.u32 %s3419_s23, 4  ;;  %s3357_s27 = int_to_ptr.vmem [resolvable:$false] %s3356_s27 }
  0x19   : > { %v3542_v18 = vld [vmem:[%s192_s12] sm:$0xff]  ;;  %v234_v54 = vld [vmem:[%s3994_s1 + $0x128] sm:$0xff]  ;;  %v3223_v55 = vpack.c.bf16 %v230_v52, %v229_v51  ;;  %v232_v58 = vld [vmem:[%s3994_s1 + $0x118] sm:$0xff]  ;;  %s2664_s12 = sshll.u32 %s188_s11, 4  ;;  %s3358_s28 = scalar_lea.vmem %s3357_s27, 256  ;;  %s3952_s12 = int_to_ptr.vmem [resolvable:$true] %s2664_s12 }
  0x1a   : > { %2903 = vmatmul.mubr.msk.f32.vlgmr.msra.gmra.mrb[0].mxu0 %vm277_vm1, %v3542_v18  ;;  %2914 = vmatmul.mubr.msk.f32.vlgmr.msra.gmra.mrb[0].mxu1 %vm277_vm1, %v3542_v18  ;;  %v3229_v56 = vpack.c.bf16 %v234_v54, %v233_v53  ;;  %v235_v59 = vld [vmem:[%s3994_s1 + $0x130] sm:$0xff]  ;;  %v236_v60 = vld [vmem:[%s3994_s1 + $0x138] sm:$0xff]  ;;  %v3226_v61 = vpack.c.bf16 %v232_v58, %v231_v57  ;;  %v237_v63 = vld [vmem:[%s3994_s1 + $0x140] sm:$0xff]  ;;  %s3352_s22 = scalar_lea.vmem %s3952_s12, 128  ;;  %p3359_p0 = scmp.lt.s32.totalorder %s3952_s12, %s3357_s27 }
  0x1b   : > { %3188 = vmatpush3.bf16.msra.mxu0 %v3187_v19  ;;  %3194 = vmatpush3.bf16.msra.mxu1 %v3193_v20  ;;  %v3232_v62 = vpack.c.bf16 %v236_v60, %v235_v59  ;;  %v238_v0 = vld [vmem:[%s3994_s1 + $0x148] sm:$0xff]  ;;  %v241_v1 = vld [vmem:[%s3994_s1 + $0x160] sm:$0xff]  ;;  %v239_v6 = vld [vmem:[%s3994_s1 + $0x150] sm:$0xff]  ;;  %p3353_p11 = scmp.ne.s32.totalorder %s3952_s12, %s3352_s22  ;;  %p3360_p1 = scmp.lt.s32.totalorder %s3358_s28, %s3352_s22 }
  0x1c   : > { %3189 = vmatprep.subr.bf16.mxu0 %v3416_v3  ;;  %3195 = vmatprep.subr.bf16.mxu1 %v3416_v3  ;;  %v242_v2 = vld [vmem:[%s3994_s1 + $0x168] sm:$0xff]  ;;  %v3235_v4 = vpack.c.bf16 %v238_v0, %v237_v63  ;;  %v240_v7 = vld [vmem:[%s3994_s1 + $0x158] sm:$0xff]  ;;  %v243_v8 = vld [vmem:[%s3994_s1 + $0x170] sm:$0xff] }
  0x1d   : > { %2924 = vmatprep.mubr.msk.f32.mxu0 %vm3417_vm0, %v3418_v11  ;;  %2935 = vmatprep.mubr.msk.f32.mxu1 %vm3417_vm0, %v3418_v11  ;;  %v3241_v5 = vpack.c.bf16 %v242_v2, %v241_v1  ;;  %v244_v9 = vld [vmem:[%s3994_s1 + $0x178] sm:$0xff]  ;;  %v3238_v10 = vpack.c.bf16 %v240_v7, %v239_v6  ;;  %v245_v13 = vld [vmem:[%s3994_s1 + $0x180] sm:$0xff]  ;;  %v246_v14 = vld [vmem:[%s3994_s1 + $0x188] sm:$0xff]  ;;  %p3354_p12 = pnand %p3353_p11, %p3483_p5  ;;  %p3361_p2 = por %p3360_p1, %p3359_p0 }
  0x1e   : > { %v3244_v12 = vpack.c.bf16 %v244_v9, %v243_v8  ;;  %v249_v15 = vld [vmem:[%s3994_s1 + $0x1a0] sm:$0xff]  ;;  %v250_v16 = vld [vmem:[%s3994_s1 + $0x1a8] sm:$0xff]  ;;  %v3247_v17 = vpack.c.bf16 %v246_v14, %v245_v13  ;;  %v247_v20 = vld [vmem:[%s3994_s1 + $0x190] sm:$0xff] }
  0x1f   : > { %3191 = vmatpush3.bf16.msra.mxu0 %v3190_v25  ;;  %3197 = vmatpush3.bf16.msra.mxu1 %v3196_v26  ;;  %v3253_v19 = vpack.c.bf16 %v250_v16, %v249_v15  ;;  %v248_v21 = vld [vmem:[%s3994_s1 + $0x198] sm:$0xff]  ;;  %v251_v22 = vld [vmem:[%s3994_s1 + $0x1b0] sm:$0xff]  ;;  %v253_v26 = vld [vmem:[%s3994_s1 + $0x1c0] sm:$0xff]  ;;  %p3355_p13 = pneg %p3354_p12 }
  0x20   : > { %3198 = vmatprep.subr.bf16.mxu0 %v3416_v3  ;;  %3204 = vmatprep.subr.bf16.mxu1 %v3416_v3  ;;  %v252_v23 = vld [vmem:[%s3994_s1 + $0x1b8] sm:$0xff]  ;;  %v3250_v24 = vpack.c.bf16 %v248_v21, %v247_v20  ;;  %v254_v27 = vld [vmem:[%s3994_s1 + $0x1c8] sm:$0xff]  ;;  %v257_v28 = vld [vmem:[%s3994_s1 + $0x1e0] sm:$0xff] }
  0x21   : > { %v3256_v25 = vpack.c.bf16 %v252_v23, %v251_v22  ;;  %v258_v29 = vld [vmem:[%s3994_s1 + $0x1e8] sm:$0xff]  ;;  %v3259_v30 = vpack.c.bf16 %v254_v27, %v253_v26  ;;  %v256_v33 = vld [vmem:[%s3994_s1 + $0x1d8] sm:$0xff]  ;;  %v259_v34 = vld [vmem:[%s3994_s1 + $0x1f0] sm:$0xff]  ;;  %p3362_p3 = pnand %p3361_p2, %p3355_p13 }
  0x22   : > { %2925 = vmatmul.mubr.msk.f32.vlgmr.msra.gmra.mrb[2].mxu0 %vm277_vm1, %v3542_v18  ;;  %2936 = vmatmul.mubr.msk.f32.vlgmr.msra.gmra.mrb[2].mxu1 %vm277_vm1, %v3542_v18  ;;  %v260_v35 = vld [vmem:[%s3994_s1 + $0x1f8] sm:$0xff]  ;;  %v262_v39 = vld [vmem:[%s3994_s1 + $0x208] sm:$0xff]  ;;  %v265_v40 = vld [vmem:[%s3994_s1 + $0x220] sm:$0xff] }
  0x23   : > { %3200 = vmatpush3.bf16.msra.mxu0 %v3199_v31  ;;  %3206 = vmatpush3.bf16.msra.mxu1 %v3205_v32  ;;  %v3265_v31 = vpack.c.bf16 %v258_v29, %v257_v28  ;;  %v255_v32 = vld [vmem:[%s3994_s1 + $0x1d0] sm:$0xff]  ;;  %v266_v42 = vld [vmem:[%s3994_s1 + $0x228] sm:$0xff]  ;;  %v264_v45 = vld [vmem:[%s3994_s1 + $0x218] sm:$0xff] }
  0x24   : > { %3201 = vmatprep.subr.bf16.mxu0 %v3416_v3  ;;  %3207 = vmatprep.subr.bf16.mxu1 %v3416_v3  ;;  %v3262_v36 = vpack.c.bf16 %v256_v33, %v255_v32  ;;  %v267_v46 = vld [vmem:[%s3994_s1 + $0x230] sm:$0xff]  ;;  %v268_v48 = vld [vmem:[%s3994_s1 + $0x238] sm:$0xff]  ;;  %v270_v51 = vld [vmem:[%s3994_s1 + $0x248] sm:$0xff] }
  0x25   : > { %2946 = vmatprep.mubr.msk.f32.mxu0 %vm3417_vm0, %v3418_v11  ;;  %2957 = vmatprep.mubr.msk.f32.mxu1 %vm3417_vm0, %v3418_v11  ;;  %v273_v52 = vld [vmem:[%s3994_s1 + $0x260] sm:$0xff]  ;;  %v274_v54 = vld [vmem:[%s3994_s1 + $0x268] sm:$0xff]  ;;  %v272_v57 = vld [vmem:[%s3994_s1 + $0x258] sm:$0xff] }
  0x26   : > { %v275_v58 = vld [vmem:[%s3994_s1 + $0x270] sm:$0xff]  ;;  %v276_v60 = vld [vmem:[%s3994_s1 + $0x278] sm:$0xff]  ;;  %v194_v6 = vld [vmem:[%s3996_s3] sm:$0xff] }
  0x27   : > { %3203 = vmatpush3.bf16.msra.mxu0 %v3202_v37  ;;  %3209 = vmatpush3.bf16.msra.mxu1 %v3208_v38  ;;  %v3268_v37 = vpack.c.bf16 %v260_v35, %v259_v34  ;;  %v261_v38 = vld [vmem:[%s3994_s1 + $0x200] sm:$0xff] }
  0x28   : > { %3210 = vmatprep.subr.bf16.mxu0 %v3416_v3  ;;  %3216 = vmatprep.subr.bf16.mxu1 %v3416_v3  ;;  %v3271_v41 = vpack.c.bf16 %v262_v39, %v261_v38 }
  0x2a   : > { %2947 = vmatmul.mubr.msk.f32.vlgmr.msra.gmra.mrb[4].mxu0 %vm277_vm1, %v3542_v18  ;;  %2958 = vmatmul.mubr.msk.f32.vlgmr.msra.gmra.mrb[4].mxu1 %vm277_vm1, %v3542_v18 }
  0x2b   : > { %3212 = vmatpush3.bf16.msra.mxu0 %v3211_v43  ;;  %3218 = vmatpush3.bf16.msra.mxu1 %v3217_v44  ;;  %v3277_v43 = vpack.c.bf16 %v266_v42, %v265_v40  ;;  %v263_v44 = vld [vmem:[%s3994_s1 + $0x210] sm:$0xff] }
  0x2c   : > { %3213 = vmatprep.subr.bf16.mxu0 %v3416_v3  ;;  %3219 = vmatprep.subr.bf16.mxu1 %v3416_v3  ;;  %v3274_v47 = vpack.c.bf16 %v264_v45, %v263_v44 }
  0x2d   : > { %2968 = vmatprep.mubr.msk.f32.mxu0 %vm3417_vm0, %v3418_v11  ;;  %2979 = vmatprep.mubr.msk.f32.mxu1 %vm3417_vm0, %v3418_v11 }
  0x2f   : > { %3215 = vmatpush3.bf16.msra.mxu0 %v3214_v49  ;;  %3221 = vmatpush3.bf16.msra.mxu1 %v3220_v50  ;;  %v3280_v49 = vpack.c.bf16 %v268_v48, %v267_v46  ;;  %v269_v50 = vld [vmem:[%s3994_s1 + $0x240] sm:$0xff] }
  0x30   : > { %3222 = vmatprep.subr.bf16.mxu0 %v3416_v3  ;;  %3228 = vmatprep.subr.bf16.mxu1 %v3416_v3  ;;  %v3283_v53 = vpack.c.bf16 %v270_v51, %v269_v50 }
  0x32   : > { %2969 = vmatmul.mubr.msk.f32.vlgmr.msra.gmra.mrb[6].mxu0 %vm277_vm1, %v3542_v18  ;;  %2980 = vmatmul.mubr.msk.f32.vlgmr.msra.gmra.mrb[6].mxu1 %vm277_vm1, %v3542_v18 }
  0x33   : > { %3224 = vmatpush3.bf16.msra.mxu0 %v3223_v55  ;;  %3230 = vmatpush3.bf16.msra.mxu1 %v3229_v56  ;;  %v3289_v55 = vpack.c.bf16 %v274_v54, %v273_v52  ;;  %v271_v56 = vld [vmem:[%s3994_s1 + $0x250] sm:$0xff] }
  0x34   : > { %3225 = vmatprep.subr.bf16.mxu0 %v3416_v3  ;;  %3231 = vmatprep.subr.bf16.mxu1 %v3416_v3  ;;  %v3286_v59 = vpack.c.bf16 %v272_v57, %v271_v56 }
  0x35   : > { %2990 = vmatprep.mubr.msk.f32.mxu0 %vm3417_vm0, %v3418_v11  ;;  %3001 = vmatprep.mubr.msk.f32.mxu1 %vm3417_vm0, %v3418_v11 }
  0x37   : > { %3227 = vmatpush3.bf16.msra.mxu0 %v3226_v61  ;;  %3233 = vmatpush3.bf16.msra.mxu1 %v3232_v62  ;;  %v3292_v61 = vpack.c.bf16 %v276_v60, %v275_v58 }
  0x38   : > { %3234 = vmatprep.subr.bf16.mxu0 %v3416_v3  ;;  %3240 = vmatprep.subr.bf16.mxu1 %v3416_v3 }
  0x3a   : > { %2991 = vmatmul.mubr.msk.f32.vlgmr.msra.gmra.mrb[8].mxu0 %vm277_vm1, %v3542_v18  ;;  %3002 = vmatmul.mubr.msk.f32.vlgmr.msra.gmra.mrb[8].mxu1 %vm277_vm1, %v3542_v18 }
  0x3b   : > { %3236 = vmatpush3.bf16.msra.mxu0 %v3235_v4  ;;  %3242 = vmatpush3.bf16.msra.mxu1 %v3241_v5 }
  0x3c   : > { %3237 = vmatprep.subr.bf16.mxu0 %v3416_v3  ;;  %3243 = vmatprep.subr.bf16.mxu1 %v3416_v3 }
  0x3d   : > { %3012 = vmatprep.mubr.msk.f32.mxu0 %vm3417_vm0, %v3418_v11  ;;  %3023 = vmatprep.mubr.msk.f32.mxu1 %vm3417_vm0, %v3418_v11 }
  0x3f   : > { %3239 = vmatpush3.bf16.msra.mxu0 %v3238_v10  ;;  %3245 = vmatpush3.bf16.msra.mxu1 %v3244_v12 }
  0x40   : > { %3246 = vmatprep.subr.bf16.mxu0 %v3416_v3  ;;  %3252 = vmatprep.subr.bf16.mxu1 %v3416_v3 }
  0x42   : > { %3013 = vmatmul.mubr.msk.f32.vlgmr.msra.gmra.mrb[10].mxu0 %vm277_vm1, %v3542_v18  ;;  %3024 = vmatmul.mubr.msk.f32.vlgmr.msra.gmra.mrb[10].mxu1 %vm277_vm1, %v3542_v18 }
  0x43   : > { %3248 = vmatpush3.bf16.msra.mxu0 %v3247_v17  ;;  %3254 = vmatpush3.bf16.msra.mxu1 %v3253_v19 }
  0x44   : > { %3249 = vmatprep.subr.bf16.mxu0 %v3416_v3  ;;  %3255 = vmatprep.subr.bf16.mxu1 %v3416_v3 }
  0x45   : > { %3034 = vmatprep.mubr.msk.f32.mxu0 %vm3417_vm0, %v3418_v11  ;;  %3045 = vmatprep.mubr.msk.f32.mxu1 %vm3417_vm0, %v3418_v11 }
  0x47   : > { %3251 = vmatpush3.bf16.msra.mxu0 %v3250_v24  ;;  %3257 = vmatpush3.bf16.msra.mxu1 %v3256_v25 }
  0x48   : > { %3258 = vmatprep.subr.bf16.mxu0 %v3416_v3  ;;  %3264 = vmatprep.subr.bf16.mxu1 %v3416_v3 }
  0x4a   : > { %3035 = vmatmul.mubr.msk.f32.vlgmr.msra.gmra.mrb[12].mxu0 %vm277_vm1, %v3542_v18  ;;  %3046 = vmatmul.mubr.msk.f32.vlgmr.msra.gmra.mrb[12].mxu1 %vm277_vm1, %v3542_v18 }
  0x4b   : > { %3260 = vmatpush3.bf16.msra.mxu0 %v3259_v30  ;;  %3266 = vmatpush3.bf16.msra.mxu1 %v3265_v31 }
  0x4c   : > { %3261 = vmatprep.subr.bf16.mxu0 %v3416_v3  ;;  %3267 = vmatprep.subr.bf16.mxu1 %v3416_v3 }
  0x4d   : > { %3056 = vmatprep.mubr.msk.f32.mxu0 %vm3417_vm0, %v3418_v11  ;;  %3067 = vmatprep.mubr.msk.f32.mxu1 %vm3417_vm0, %v3418_v11 }
  0x4f   : > { %3263 = vmatpush3.bf16.msra.mxu0 %v3262_v36  ;;  %3269 = vmatpush3.bf16.msra.mxu1 %v3268_v37 }
  0x50   : > { %3270 = vmatprep.subr.bf16.mxu0 %v3416_v3  ;;  %3276 = vmatprep.subr.bf16.mxu1 %v3416_v3 }
  0x52   : > { %3057 = vmatmul.mubr.msk.f32.vlgmr.msra.gmra.mrb[14].mxu0 %vm277_vm1, %v3542_v18  ;;  %3068 = vmatmul.mubr.msk.f32.vlgmr.msra.gmra.mrb[14].mxu1 %vm277_vm1, %v3542_v18 }
  0x53   : > { %3078 = vmatprep.mubr.msk.f32.mxu0 %vm3417_vm0, %v3418_v11  ;;  %3089 = vmatprep.mubr.msk.f32.mxu1 %vm3417_vm0, %v3418_v11 }
  0x54   : > { %3272 = vmatpush3.bf16.msra.mxu0 %v3271_v41  ;;  %3278 = vmatpush3.bf16.msra.mxu1 %v3277_v43 }
  0x55   : > { %3273 = vmatprep.subr.bf16.mxu0 %v3416_v3  ;;  %3279 = vmatprep.subr.bf16.mxu1 %v3416_v3 }
  0x58   : > { %3275 = vmatpush3.bf16.msra.mxu0 %v3274_v47  ;;  %3281 = vmatpush3.bf16.msra.mxu1 %v3280_v49 }
  0x59   : > { %3282 = vmatprep.subr.bf16.mxu0 %v3416_v3  ;;  %3288 = vmatprep.subr.bf16.mxu1 %v3416_v3 }
  0x5b   : > { %3079 = vmatmul.mubr.msk.f32.vlgmr.msra.gmra.mrb[16].mxu0 %vm277_vm1, %v3542_v18  ;;  %3090 = vmatmul.mubr.msk.f32.vlgmr.msra.gmra.mrb[16].mxu1 %vm277_vm1, %v3542_v18 }
  0x5c   : > { %3284 = vmatpush3.bf16.msra.mxu0 %v3283_v53  ;;  %3290 = vmatpush3.bf16.msra.mxu1 %v3289_v55 }
  0x5d   : > { %3285 = vmatprep.subr.bf16.mxu0 %v3416_v3  ;;  %3291 = vmatprep.subr.bf16.mxu1 %v3416_v3 }
  0x5e   : > { %3100 = vmatprep.mubr.msk.f32.mxu0 %vm3417_vm0, %v3418_v11  ;;  %3111 = vmatprep.mubr.msk.f32.mxu1 %vm3417_vm0, %v3418_v11 }
  0x60   : > { %3287 = vmatpush3.bf16.msra.mxu0 %v3286_v59  ;;  %3293 = vmatpush3.bf16.msra.mxu1 %v3292_v61 }
  0x61   : > { %3114 = vmatprep.subr.mxu0 %v3418_v11  ;;  %3119 = vmatprep.subr.mxu1 %v3418_v11 }
  0x63   : > { %3101 = vmatmul.mubr.msk.f32.vlgmr.msra.gmra.mrb[18].mxu0 %vm277_vm1, %v3542_v18  ;;  %3112 = vmatmul.mubr.msk.f32.vlgmr.msra.gmra.mrb[18].mxu1 %vm277_vm1, %v3542_v18  ;;  %v2729_v18 = vld [vmem:[%s3996_s3 + $0x8] sm:$0xff] }
  0x64   : > { %3116 = vmatprep.mubr.msk.f32.mxu0 %vm3417_vm0, %v3418_v11  ;;  %3121 = vmatprep.mubr.msk.f32.mxu1 %vm3417_vm0, %v3418_v11 }
  0xed   : > { %v347_v3 = vpop.f32.mrb[0].mxu0  ;;  %v417_v63 = vpop.f32.mrb[0].mxu1 }
  0xee   : > { %v2904_v62 = vpop.f32.mrb[1].mxu0  ;;  %v2915_v0 = vpop.f32.mrb[1].mxu1  ;;  %v1681_v8 = vmul.f32 %v347_v3, %v194_v6  ;;  %v1682_v13 = vmul.f32 %v417_v63, %v194_v6 }
  0xf5   : > { %v487_v1 = vpop.f32.mrb[2].mxu0  ;;  %v557_v4 = vpop.f32.mrb[2].mxu1 }
  0xf6   : > { %v2926_v2 = vpop.f32.mrb[3].mxu0  ;;  %v2937_v5 = vpop.f32.mrb[3].mxu1  ;;  %v1683_v20 = vmul.f32 %v487_v1, %v194_v6  ;;  %v1684_v24 = vmul.f32 %v557_v4, %v194_v6 }
  0xfd   : > { %v627_v7 = vpop.f32.mrb[4].mxu0  ;;  %v697_v10 = vpop.f32.mrb[4].mxu1 }
  0xfe   : > { %v1685_v9 = vmul.f32 %v2729_v18, %v627_v7  ;;  %v2948_v12 = vpop.f32.mrb[5].mxu0  ;;  %v1686_v14 = vmul.f32 %v2729_v18, %v697_v10  ;;  %v2959_v15 = vpop.f32.mrb[5].mxu1 }
 0x100   : > { %v1689_v16 = vadd.f32 %v1685_v9, %v1681_v8  ;;  %v1690_v17 = vadd.f32 %v1686_v14, %v1682_v13 }
 0x105   : > { %v767_v19 = vpop.f32.mrb[6].mxu0  ;;  %v837_v22 = vpop.f32.mrb[6].mxu1 }
 0x106   : > { %v1687_v21 = vmul.f32 %v2729_v18, %v767_v19  ;;  %v2970_v23 = vpop.f32.mrb[7].mxu0  ;;  %v1688_v25 = vmul.f32 %v2729_v18, %v837_v22  ;;  %v2981_v26 = vpop.f32.mrb[7].mxu1 }
 0x108   : > { %v1691_v27 = vadd.f32 %v1687_v21, %v1683_v20  ;;  %v1692_v28 = vadd.f32 %v1688_v25, %v1684_v24 }
 0x10d   : > { %v907_v29 = vpop.f32.mrb[8].mxu0  ;;  %v977_v31 = vpop.f32.mrb[8].mxu1 }
 0x10e   : > { %v2992_v30 = vpop.f32.mrb[9].mxu0  ;;  %v3003_v32 = vpop.f32.mrb[9].mxu1  ;;  %v1693_v38 = vmul.f32 %v907_v29, %v194_v6  ;;  %v1694_v42 = vmul.f32 %v977_v31, %v194_v6 }
 0x115   : > { %v1047_v33 = vpop.f32.mrb[10].mxu0  ;;  %v1117_v35 = vpop.f32.mrb[10].mxu1 }
 0x116   : > { %v3014_v34 = vpop.f32.mrb[11].mxu0  ;;  %v3025_v36 = vpop.f32.mrb[11].mxu1  ;;  %v1695_v48 = vmul.f32 %v1047_v33, %v194_v6  ;;  %v1696_v52 = vmul.f32 %v1117_v35, %v194_v6 }
 0x11d   : > { %v1187_v37 = vpop.f32.mrb[12].mxu0  ;;  %v1257_v40 = vpop.f32.mrb[12].mxu1 }
 0x11e   : > { %v1697_v39 = vmul.f32 %v2729_v18, %v1187_v37  ;;  %v3036_v41 = vpop.f32.mrb[13].mxu0  ;;  %v1698_v43 = vmul.f32 %v2729_v18, %v1257_v40  ;;  %v3047_v44 = vpop.f32.mrb[13].mxu1 }
 0x120   : > { %v1701_v45 = vadd.f32 %v1697_v39, %v1693_v38  ;;  %v1702_v46 = vadd.f32 %v1698_v43, %v1694_v42 }
 0x122   : > { %3115 = vmatpush3.xpose.msk.msra.mxu0 %vm1705_vm2, %v1701_v45  ;;  %3120 = vmatpush3.xpose.msk.msra.mxu1 %vm1705_vm2, %v1702_v46  ;;  %v2346_v46 = vld [vmem:[%s3995_s2] sm:$0xff] }
 0x123   : > { %3124 = vmatprep.subr.mxu0 %v3418_v11  ;;  %3129 = vmatprep.subr.mxu1 %v3418_v11 }
 0x125   : > { %v1327_v47 = vpop.f32.mrb[14].mxu0  ;;  %3117 = vmatmul.mubr.msk.f32.vlgmr.msra.gmra.mrb[20].mxu0 %vm1705_vm2, %v1689_v16  ;;  %v1397_v50 = vpop.f32.mrb[14].mxu1  ;;  %3122 = vmatmul.mubr.msk.f32.vlgmr.msra.gmra.mrb[20].mxu1 %vm1705_vm2, %v1690_v17 }
 0x126   : > { %v1699_v49 = vmul.f32 %v2729_v18, %v1327_v47  ;;  %v3058_v51 = vpop.f32.mrb[15].mxu0  ;;  %3126 = vmatprep.mubr.msk.f32.mxu0 %vm3417_vm0, %v3418_v11  ;;  %v1700_v53 = vmul.f32 %v2729_v18, %v1397_v50  ;;  %v3069_v54 = vpop.f32.mrb[15].mxu1  ;;  %3131 = vmatprep.mubr.msk.f32.mxu1 %vm3417_vm0, %v3418_v11  ;;  %v2347_v47 = vld [vmem:[%s3995_s2 + $0x8] sm:$0xff] }
 0x127   : > { %v2349_v51 = vld [vmem:[%s3995_s2 + $0x18] sm:$0xff] }
 0x128   : > { %v1703_v55 = vadd.f32 %v1699_v49, %v1695_v48  ;;  %v1704_v56 = vadd.f32 %v1700_v53, %v1696_v52  ;;  %v2348_v48 = vld [vmem:[%s3995_s2 + $0x10] sm:$0xff] }
 0x12a   : > { %3125 = vmatpush3.xpose.msk.msra.mxu0 %vm1705_vm2, %v1703_v55  ;;  %3130 = vmatpush3.xpose.msk.msra.mxu1 %vm1705_vm2, %v1704_v56 }
 0x12b   : > { %3134 = vmatprep.subr.mxu0 %v3418_v11  ;;  %3139 = vmatprep.subr.mxu1 %v3418_v11 }
 0x12d   : > { %3127 = vmatmul.mubr.msk.f32.vlgmr.msra.gmra.mrb[22].mxu0 %vm1705_vm2, %v1691_v27  ;;  %3132 = vmatmul.mubr.msk.f32.vlgmr.msra.gmra.mrb[22].mxu1 %vm1705_vm2, %v1692_v28 }
 0x12e   : > { %3136 = vmatprep.mubr.msk.f32.mxu0 %vm3417_vm0, %v3418_v11  ;;  %3141 = vmatprep.mubr.msk.f32.mxu1 %vm3417_vm0, %v3418_v11  ;;  %v1467_v57 = vpop.f32.mrb[16].mxu0  ;;  %v1537_v59 = vpop.f32.mrb[16].mxu1 }
 0x12f   : > { %v3080_v58 = vpop.f32.mrb[17].mxu0  ;;  %3135 = vmatpush3.msra.mxu0 %v1467_v57  ;;  %v3091_v60 = vpop.f32.mrb[17].mxu1  ;;  %3140 = vmatpush3.msra.mxu1 %v1537_v59 }
 0x130   : > { %3144 = vmatprep.subr.mxu0 %v3418_v11  ;;  %3149 = vmatprep.subr.mxu1 %v3418_v11 }
 0x136   : > { %v1607_v61 = vpop.f32.mrb[18].mxu0  ;;  %v3894_v3 = vpop.f32.mrb[18].mxu1 }
 0x137   : > { %v3102_v62 = vpop.f32.mrb[19].mxu0  ;;  %v3113_v63 = vpop.f32.mrb[19].mxu1 }
 0x1f8   : > { %v1778_v0 = vpop.f32.mrb[20].mxu0  ;;  %v1854_v1 = vpop.f32.mrb[20].mxu1 }
 0x1f9   : > { %v3118_v2 = vpop.f32.mrb[21].mxu0  ;;  %v2010_v4 = vsel %vm1705_vm2, %v1778_v0, -inf  ;;  %v3123_v5 = vpop.f32.mrb[21].mxu1  ;;  %v2013_v6 = vsel %vm1705_vm2, %v1854_v1, -inf }
 0x1fa   : > { %2011 = vmax.xlane.f32.xlu0 %v2010_v4 }
 0x1fe   : > { %2014 = vmax.xlane.f32.xlu0 %v2013_v6 }
 0x200   : > { %v1930_v18 = vpop.f32.mrb[22].mxu0  ;;  %v2006_v7 = vpop.f32.mrb[22].mxu1 }
 0x201   : > { %v3128_v8 = vpop.f32.mrb[23].mxu0  ;;  %v2016_v9 = vsel %vm1705_vm2, %v1930_v18, -inf  ;;  %v3133_v10 = vpop.f32.mrb[23].mxu1  ;;  %v2019_v12 = vsel %vm1705_vm2, %v2006_v7, -inf }
 0x202   : > { %2017 = vmax.xlane.f32.xlu1 %v2016_v9 }
 0x206   : > { %2020 = vmax.xlane.f32.xlu1 %v2019_v12 }
 0x287   : > { %v2012_v13 = vpop.xlane.xlu0 %2011 }
 0x288   : > { %v2022_v14 = vsub.f32 %v1778_v0, %v2012_v13 }
 0x28a   : > { %v2026_v15 = vmul.f32 1.442695, %v2022_v14 }
 0x28b   : > { %v2015_v16 = vpop.xlane.xlu0 %2014 }
 0x28c   : > { %3336 = vpow2.f32 %v2026_v15  ;;  %v2023_v17 = vsub.f32 %v1854_v1, %v2015_v16 }
 0x28e   : > { %v2028_v19 = vmul.f32 1.442695, %v2023_v17 }
 0x28f   : > { %v2018_v20 = vpop.xlane.xlu1 %2017 }
 0x290   : > { %3338 = vpow2.f32 %v2028_v19  ;;  %v2024_v21 = vsub.f32 %v1930_v18, %v2018_v20 }
 0x292   : > { %v2030_v22 = vmul.f32 1.442695, %v2024_v21 }
 0x293   : > { %v2021_v23 = vpop.xlane.xlu1 %2020 }
 0x294   : > { %3340 = vpow2.f32 %v2030_v22  ;;  %v2025_v24 = vsub.f32 %v2006_v7, %v2021_v23 }
 0x296   : > { %v3337_v25 = vpop.eup %3336  ;;  %v2032_v26 = vmul.f32 1.442695, %v2025_v24 }
 0x297   : > { %v2034_v27 = vsel %vm1705_vm2, %v3337_v25, 0.0 }
 0x298   : > { %3342 = vpow2.f32 %v2032_v26  ;;  %2035 = vadd.xlane.f32.xlu0 %v2034_v27 }
 0x29a   : > { %v3339_v28 = vpop.eup %3338 }
 0x29b   : > { %v2037_v29 = vsel %vm1705_vm2, %v3339_v28, 0.0 }
 0x29c   : > { %2038 = vadd.xlane.f32.xlu1 %v2037_v29 }
 0x29e   : > { %v3341_v30 = vpop.eup %3340 }
 0x29f   : > { %v2040_v31 = vsel %vm1705_vm2, %v3341_v30, 0.0 }
 0x2a0   : > { %2041 = vadd.xlane.f32.xlu0 %v2040_v31 }
 0x2a2   : > { %v3343_v32 = vpop.eup %3342 }
 0x2a3   : > { %v2043_v33 = vsel %vm1705_vm2, %v3343_v32, 0.0 }
 0x2a4   : > { %2044 = vadd.xlane.f32.xlu1 %v2043_v33 }
 0x325   : > { %v2036_v34 = vpop.xlane.xlu0 %2035 }
 0x326   : > { %3344 = vrcp.f32 %v2036_v34 }
 0x329   : > { %v2039_v35 = vpop.xlane.xlu1 %2038 }
 0x32a   : > { %3346 = vrcp.f32 %v2039_v35 }
 0x32d   : > { %v2042_v36 = vpop.xlane.xlu0 %2041 }
 0x32e   : > { %3348 = vrcp.f32 %v2042_v36 }
 0x330   : > { %v3345_v37 = vpop.eup %3344 }
 0x331   : > { %v2047_v38 = vmul.f32 %v3345_v37, %v3337_v25  ;;  %v2045_v39 = vpop.xlane.xlu1 %2044 }
 0x332   : > { %3350 = vrcp.f32 %v2045_v39 }
 0x333   : > { %3137 = vmatmul.mubr.msk.f32.vlgmr.msra.gmra.mrb[24].mxu0 %vm1705_vm2, %v2047_v38 }
 0x334   : > { %v3347_v40 = vpop.eup %3346  ;;  %3145 = vmatpush3.msra.mxu0 %v1607_v61  ;;  %3146 = vmatprep.mubr.msk.f32.mxu0 %vm3417_vm0, %v3418_v11 }
 0x335   : > { %v2049_v41 = vmul.f32 %v3347_v40, %v3339_v28  ;;  %3154 = vmatprep.subr.mxu0 %v3418_v11 }
 0x337   : > { %3142 = vmatmul.mubr.msk.f32.vlgmr.msra.gmra.mrb[24].mxu1 %vm1705_vm2, %v2049_v41 }
 0x338   : > { %v3349_v42 = vpop.eup %3348  ;;  %3150 = vmatpush3.msra.mxu1 %v3894_v3  ;;  %3151 = vmatprep.mubr.msk.f32.mxu1 %vm3417_vm0, %v3418_v11 }
 0x339   : > { %v2051_v43 = vmul.f32 %v3349_v42, %v3341_v30  ;;  %3159 = vmatprep.subr.mxu1 %v3418_v11 }
 0x33b   : > { %3147 = vmatmul.mubr.msk.f32.vlgmr.msra.gmra.mrb[26].mxu0 %vm1705_vm2, %v2051_v43 }
 0x33c   : > { %v3351_v44 = vpop.eup %3350  ;;  %3156 = vmatprep.mubr.msk.f32.mxu0 %vm3417_vm0, %v3418_v11  ;;  %3155 = vmatpush3.msra.mxu0 %v2346_v46 }
 0x33d   : > { %v2053_v45 = vmul.f32 %v3351_v44, %v3343_v32  ;;  %3164 = vmatprep.subr.mxu0 %v3418_v11 }
 0x33f   : > { %3152 = vmatmul.mubr.msk.f32.vlgmr.msra.gmra.mrb[26].mxu1 %vm1705_vm2, %v2053_v45 }
 0x340   : > { %3161 = vmatprep.mubr.msk.f32.mxu1 %vm3417_vm0, %v3418_v11  ;;  %3160 = vmatpush3.msra.mxu1 %v2347_v47 }
 0x341   : > { %3169 = vmatprep.subr.mxu1 %v3418_v11 }
 0x406   : > { %v2123_v49 = vpop.f32.mrb[24].mxu0 }
 0x407   : > { %v3138_v50 = vpop.f32.mrb[25].mxu0  ;;  %3157 = vmatmul.mubr.msk.f32.vlgmr.msra.gmra.mrb[28].mxu0 %vm1705_vm2, %v2123_v49 }
 0x408   : > { %3165 = vmatpush3.msra.mxu0 %v2348_v48  ;;  %3166 = vmatprep.mubr.msk.f32.mxu0 %vm3417_vm0, %v3418_v11 }
 0x40a   : > { %v2196_v52 = vpop.f32.mrb[24].mxu1 }
 0x40b   : > { %v3143_v53 = vpop.f32.mrb[25].mxu1  ;;  %3162 = vmatmul.mubr.msk.f32.vlgmr.msra.gmra.mrb[28].mxu1 %vm1705_vm2, %v2196_v52 }
 0x40c   : > { %3170 = vmatpush3.msra.mxu1 %v2349_v51  ;;  %3171 = vmatprep.mubr.msk.f32.mxu1 %vm3417_vm0, %v3418_v11 }
 0x40e   : > { %v2269_v54 = vpop.f32.mrb[26].mxu0 }
 0x40f   : > { %v3148_v55 = vpop.f32.mrb[27].mxu0  ;;  %3167 = vmatmul.mubr.msk.f32.vlgmr.msra.gmra.mrb[30].mxu0 %vm1705_vm2, %v2269_v54 }
 0x412   : > { %v2342_v56 = vpop.f32.mrb[26].mxu1 }
 0x413   : > { %v3153_v57 = vpop.f32.mrb[27].mxu1  ;;  %3172 = vmatmul.mubr.msk.f32.vlgmr.msra.gmra.mrb[30].mxu1 %vm1705_vm2, %v2342_v56 }
 0x4da   : > { %v2419_v58 = vpop.f32.mrb[28].mxu0 }
 0x4db   : > { %v3158_v59 = vpop.f32.mrb[29].mxu0  ;;  %v2642_v61 = vsel %vm277_vm1, %v2419_v58, 0.0 }
 0x4de   : > { %v2492_v60 = vpop.f32.mrb[28].mxu1 }
 0x4df   : > { %v2643_v3 = vsel %vm277_vm1, %v2492_v60, 0.0  ;;  %v3163_v62 = vpop.f32.mrb[29].mxu1 }
 0x4e0   : > { %v2644_v11 = vadd.f32 %v2643_v3, %v2642_v61 }
 0x4e2   : > { %v2565_v63 = vpop.f32.mrb[30].mxu0 }
 0x4e3   : > { %v2645_v0 = vsel %vm277_vm1, %v2565_v63, 0.0  ;;  %v3168_v1 = vpop.f32.mrb[31].mxu0 }
 0x4e4   : > { %v2646_v2 = vadd.f32 %v2645_v0, %v2644_v11 }
 0x4e6   : > { %v2638_v4 = vpop.f32.mrb[30].mxu1 }
 0x4e7   : > { %v2647_v5 = vsel %vm277_vm1, %v2638_v4, 0.0  ;;  %v3173_v6 = vpop.f32.mrb[31].mxu1 }
 0x4e8   : > { %v2648_v18 = vadd.f32 %v2647_v5, %v2646_v2 }
 0x4ea   : > { %2649 = vst.msk [vmem:[%s188_s11] sm:$0xff] %vm277_vm1, %v2648_v18 }
 0x4eb   : > { %3365 = shalt.err (!%p3362_p3)
}
 0x4ec   : > { %s3366_s29 = scalar_lea.hbm %s3950_s20, 128  ;;  %s3370_s6 = scalar_lea.hbm %s3997_s4, 256 }
 0x4ed   : > { %p3367_p4 = scmp.ne.s32.totalorder %s3950_s20, %s3366_s29  ;;  %p3371_p9 = scmp.lt.u32.totalorder %s3950_s20, %s3997_s4 }
 0x4ee   : > { %p3372_p10 = scmp.lt.u32.totalorder %s3370_s6, %s3366_s29  ;;  %p3374_p12 = scmp.lt.u32.totalorder %s3366_s29, %s3950_s20 }
 0x4ef   : > { %p3368_p7 = pnand %p3367_p4, %p3483_p5 }
 0x4f0   : > { %p3373_p11 = por %p3372_p10, %p3371_p9 }
 0x4f1   : > { %p3369_p8 = pneg %p3368_p7 }
 0x4f2   : > { %p3375_p13 = por %p3374_p12, %p3373_p11 }
 0x4f4   : > { %p3376_p0 = pnand %p3375_p13, %p3369_p8 }
 0x4f6   : > { %3379 = shalt.err (!%p3376_p0)
}
 0x4f7   : > { %3294 = dma.vmem_to_hbm [thread:$0]  (%p3483_p5), %s3952_s12, 128, %s3950_s20, %s2651_s19  }
 0x4f8 PF: > { %p3300_p1 = scmp.ge.s32.totalorder %s3414_s18, 2  ;;  %s2676_s9 = sand.u32 1, %s3402_s15  }
 0x4f9   : > { %s2677_s10 = scalar_lea.sflag [#allocation3], %s2676_s9 }
 0x4fa   : > { %p3297_p2 = pnand %p3300_p1, %p3487_p6 }
 0x4fc   : > { %3397 = dma.done.wait (!%p3297_p2), %s2677_s10, 128  }
 0x4fd   : > { %3399 = vsyncadd (!%p3297_p2), %s2677_s10, 4294967168  ;;  %p14_p3 = scmp.ge.s32.totalorder %s3470_s21, 4   ;;  %s4000_s15 = smov %s3406_s16 }
 0x4fe   : > { %s4001_s16 = smov %s3410_s17  ;;  %s4002_s17 = smov %s3481_s24 }
 0x4ff   : > { %s4003_s18 = smov %s3470_s21  ;;  %16 = sbr.rel (!%p14_p3) target bundleno = 3 (0x3), region = 72 }
 0x506   :  { %2682 = vsyncpa [#allocation3], 1 }
 0x507   :  { %2684 = vsyncpa [#allocation3 + $0x1], 1 }

</bundles_post_ra>
